<compile_context>
chip_gen: v7x
topology: tpu7x:2x2x1
jax: 0.10.0
libtpu: 0.0.40
codegen_flags: <defaults>
</compile_context>

<pallas_src>
import functools

import jax
import jax.numpy as jnp
from jax import lax
from jax.experimental import pallas as pl
from jax.experimental.pallas import tpu as pltpu


# ---------------------------------------------------------------------------
# Shared helper: 3x3 "same" conv (no bias) for one image as 9 accumulating
# MXU dots on an NCHW-flat layout.  Returns the f32 accumulator (Cout, H*W).
# ---------------------------------------------------------------------------
def _conv3x3_acc(x_ref, w_ref, xpf_ref, *, H, W, Cin, Cout):
    HW = H * W
    OFF = W + 1                       # image starts at flat offset W+1
    L = HW + 2 * W + 2                # one padded row each side (+2 guards)

    # In-kernel zero padding: zero ONLY the halo strips, then copy the image.
    xpf_ref[:, :OFF] = jnp.zeros((Cin, OFF), xpf_ref.dtype)
    xpf_ref[:, OFF + HW:] = jnp.zeros((Cin, L - OFF - HW), xpf_ref.dtype)
    xpf_ref[:, OFF:OFF + HW] = x_ref[0].astype(xpf_ref.dtype)
    xpf = xpf_ref[...]                                        # (Cin, L)

    # A flat window at start=(dh+1)*W + 1 + dw wraps the adjacent row's edge
    # pixel into w==0 (dw=-1) / w==W-1 (dw=+1); those absolute flat positions
    # are == 0 / == 1 (mod W), so two masked copies fix width padding exactly.
    col = lax.broadcasted_iota(jnp.int32, (Cin, L), 1) % W
    zeros = jnp.zeros_like(xpf)
    xpf_l = jnp.where(col == 0, zeros, xpf)   # used by dw == -1 taps
    xpf_r = jnp.where(col == 1, zeros, xpf)   # used by dw == +1 taps

    acc = jnp.zeros((Cout, HW), jnp.float32)
    t = 0
    for dh in (-1, 0, 1):
        for dw in (-1, 0, 1):
            start = (dh + 1) * W + 1 + dw
            src = xpf_l if dw == -1 else (xpf_r if dw == 1 else xpf)
            xs = src[:, start:start + HW]                     # (Cin, H*W)
            acc = acc + jnp.dot(w_ref[t], xs,
                                preferred_element_type=jnp.float32)
            t += 1
    return acc


# ---------------------------------------------------------------------------
# Kernel A (no-BN path): conv + ReLU + concat written in one pass.
# ---------------------------------------------------------------------------
def _conv_relu_concat_kernel(x_ref, w_ref, o_ref, xpf_ref, *, H, W, Cin, Cout):
    acc = _conv3x3_acc(x_ref, w_ref, xpf_ref, H=H, W=W, Cin=Cin, Cout=Cout)
    o_ref[0, :Cin, :] = x_ref[0].astype(o_ref.dtype)
    o_ref[0, Cin:, :] = jnp.maximum(acc, 0.0).astype(o_ref.dtype)


# ---------------------------------------------------------------------------
# Kernel B (BN path, pass 1): conv + per-image partial BN stats.
# ---------------------------------------------------------------------------
def _conv_bn_stats_kernel(x_ref, w_ref, y_ref, stats_ref, xpf_ref,
                          *, H, W, Cin, Cout):
    acc = _conv3x3_acc(x_ref, w_ref, xpf_ref, H=H, W=W, Cin=Cin, Cout=Cout)
    y_ref[0] = acc.astype(y_ref.dtype)
    # Partial sums from the f32 accumulator; reduced over the batch in the
    # wrapper, so the grid axis stays "parallel".
    stats_ref[0, :, 0:1] = jnp.sum(acc, axis=1, keepdims=True)
    stats_ref[0, :, 1:2] = jnp.sum(acc * acc, axis=1, keepdims=True)


# ---------------------------------------------------------------------------
# Kernel C (BN path, pass 2): folded-BN affine + ReLU + concat, lane-dense.
# ---------------------------------------------------------------------------
def _affine_relu_concat_kernel(x_ref, y_ref, scale_ref, shift_ref, o_ref,
                               *, Cin):
    o_ref[0, :Cin, :] = x_ref[0].astype(o_ref.dtype)
    y = y_ref[0].astype(jnp.float32)          # elementwise kept in f32 (v5e)
    o_ref[0, Cin:, :] = jnp.maximum(
        y * scale_ref[...] + shift_ref[...], 0.0).astype(o_ref.dtype)


# ---------------------------------------------------------------------------
# PyTorch-facing NCHW wrapper: make_dense.forward
# ---------------------------------------------------------------------------
def make_dense_forward(x_nchw, weight_hwio, gamma, beta, is_batchnorm,
                       eps=1e-5, compute_dtype=jnp.float32):
    N, Cin, H, W = x_nchw.shape
    Cout = weight_hwio.shape[-1]
    HW = H * W
    L = HW + 2 * W + 2

    x_flat = x_nchw.reshape(N, Cin, HW)                       # free reshape
    # (3,3,Cin,Cout) -> (9, Cout, Cin): tap t = kh*3+kw, lane-dense for dots.
    w9 = jnp.transpose(weight_hwio.reshape(9, Cin, Cout),
                       (0, 2, 1)).astype(compute_dtype)

    cparams = pltpu.CompilerParams(
        dimension_semantics=("parallel",),
        vmem_limit_bytes=32 * 1024 * 1024)

    x_spec = pl.BlockSpec((1, Cin, HW), lambda n: (n, 0, 0))
    w_spec = pl.BlockSpec((9, Cout, Cin), lambda n: (0, 0, 0))
    o_spec = pl.BlockSpec((1, Cin + Cout, HW), lambda n: (n, 0, 0))
    scratch = [pltpu.VMEM((Cin, L), compute_dtype)]

    # TODO(synk): for large H*W (or v7x's 64 MiB VMEM) add a row-tile grid
    # axis with a 2-row halo and fold several rows/batch elements per step so
    # the matmul N dimension is >= ~512; re-size vmem_limit_bytes accordingly.

    if not is_batchnorm:
        out_flat = pl.pallas_call(
            functools.partial(_conv_relu_concat_kernel,
                              H=H, W=W, Cin=Cin, Cout=Cout),
            out_shape=jax.ShapeDtypeStruct((N, Cin + Cout, HW), jnp.float32),
            grid=(N,),
            in_specs=[x_spec, w_spec],
            out_specs=o_spec,
            scratch_shapes=scratch,
            compiler_params=cparams,
        )(x_flat, w9)
        return out_flat.reshape(N, Cin + Cout, H, W)

    # ---- BN path: conv + partial stats -------------------------------------
    y_dtype = compute_dtype          # bf16 intermediate halves the 2nd pass
    y, stats = pl.pallas_call(
        functools.partial(_conv_bn_stats_kernel,
                          H=H, W=W, Cin=Cin, Cout=Cout),
        out_shape=(jax.ShapeDtypeStruct((N, Cout, HW), y_dtype),
                   jax.ShapeDtypeStruct((N, Cout, 2), jnp.float32)),
        grid=(N,),
        in_specs=[x_spec, w_spec],
        out_specs=(pl.BlockSpec((1, Cout, HW), lambda n: (n, 0, 0)),
                   pl.BlockSpec((1, Cout, 2), lambda n: (n, 0, 0))),
        scratch_shapes=scratch,
        compiler_params=cparams,
    )(x_flat, w9)

    # ---- fold BN into a per-channel affine (training-mode batch stats) -----
    count = float(N * HW)
    mean = jnp.sum(stats[..., 0], axis=0) / count
    # Biased variance via E[y^2]-E[y]^2 with a clamp; adequate here, but for
    # very large N*H*W / uncentered activations a shifted two-pass sum is safer.
    var = jnp.maximum(jnp.sum(stats[..., 1], axis=0) / count - mean * mean, 0.0)
    scale = gamma * lax.rsqrt(var + eps)
    shift = beta - mean * scale
    # TODO(synk): running_mean/running_var momentum updates are stateful
    # module side effects and are not part of the returned forward value.

    out_flat = pl.pallas_call(
        functools.partial(_affine_relu_concat_kernel, Cin=Cin),
        out_shape=jax.ShapeDtypeStruct((N, Cin + Cout, HW), jnp.float32),
        grid=(N,),
        in_specs=[x_spec,
                  pl.BlockSpec((1, Cout, HW), lambda n: (n, 0, 0)),
                  pl.BlockSpec((Cout, 1), lambda n: (0, 0)),
                  pl.BlockSpec((Cout, 1), lambda n: (0, 0))],
        out_specs=o_spec,
        compiler_params=cparams,
    )(x_flat, y,
      scale.astype(jnp.float32).reshape(Cout, 1),
      shift.astype(jnp.float32).reshape(Cout, 1))
    return out_flat.reshape(N, Cin + Cout, H, W)


# ---------------------------------------------------------------------------
# Pure-JAX reference (matches PyTorch forward in training mode)
# ---------------------------------------------------------------------------
def make_dense_ref(x_nchw, weight_hwio, gamma, beta, is_batchnorm, eps=1e-5):
    w_oihw = jnp.transpose(weight_hwio, (3, 2, 0, 1))
    y = lax.conv_general_dilated(
        x_nchw, w_oihw, window_strides=(1, 1), padding="SAME",
        dimension_numbers=("NCHW", "OIHW", "NCHW"))
    if is_batchnorm:
        mean = jnp.mean(y, axis=(0, 2, 3), keepdims=True)
        var = jnp.mean((y - mean) ** 2, axis=(0, 2, 3), keepdims=True)
        y = (y - mean) * lax.rsqrt(var + eps)
        y = y * gamma.reshape(1, -1, 1, 1) + beta.reshape(1, -1, 1, 1)
    y = jnp.maximum(y, 0.0)
    return jnp.concatenate([x_nchw, y], axis=1)


if __name__ == "__main__":
    key = jax.random.PRNGKey(0)
    kx, kw, kg, kb = jax.random.split(key, 4)

    N, Cin, H, W = 2, 4, 16, 16      # nChannels = 4
    growth = 8                       # growthRate = 8, kernel_size = 3

    x = jax.random.normal(kx, (N, Cin, H, W), jnp.float32)
    weight = 0.1 * jax.random.normal(kw, (3, 3, Cin, growth), jnp.float32)  # HWIO
    gamma = 1.0 + 0.1 * jax.random.normal(kg, (growth,), jnp.float32)
    beta = 0.1 * jax.random.normal(kb, (growth,), jnp.float32)

    for is_bn in (True, False):
        ref = make_dense_ref(x, weight, gamma, beta, is_bn)

        # f32 MXU path -- tight comparison against the XLA reference.
        out = jax.block_until_ready(
            make_dense_forward(x, weight, gamma, beta, is_bn))
        assert out.shape == (N, Cin + growth, H, W), out.shape
        err = float(jnp.max(jnp.abs(out - ref)))
        assert err < 2e-3, (is_bn, err)

        # bf16 MXU path (v6e/v7x-friendly), f32 accumulation, loose tolerance.
        out_bf = jax.block_until_ready(
            make_dense_forward(x, weight, gamma, beta, is_bn,
                               compute_dtype=jnp.bfloat16))
        assert out_bf.shape == (N, Cin + growth, H, W), out_bf.shape
        assert bool(jnp.all(jnp.isfinite(out_bf)))
        errb = float(jnp.max(jnp.abs(out_bf - ref)))
        assert errb < 0.3, (is_bn, errb)

    print("KERNEL_OK")
</pallas_src>

<mosaic_0001>
module attributes {stable_mosaic.version = 11 : i64} {
  func.func @_conv_bn_stats_kernel(%arg0: i32, %arg1: memref<1x4x256xf32, #tpu.memory_space<vmem>>, %arg2: memref<9x8x4xf32, #tpu.memory_space<vmem>>, %arg3: memref<1x8x256xf32, #tpu.memory_space<vmem>>, %arg4: memref<1x8x2xf32, #tpu.memory_space<vmem>>, %arg5: memref<4x290xf32, #tpu.memory_space<vmem>>) attributes {dimension_semantics = [#tpu.dimension_semantics<parallel>], iteration_bounds = array<i64: 2>, scalar_prefetch = 0 : i64, scratch_operands = 1 : i64, tpu.core_type = #tpu.core_type<tc>, window_params = [{transform_indices = @transform_0, window_bounds = array<i64: 1, 4, 256>}, {pipeline_mode = #tpu.pipeline_mode<synchronous>, transform_indices = @transform_1, window_bounds = array<i64: 9, 8, 4>}, {transform_indices = @transform_2, window_bounds = array<i64: 1, 8, 256>}, {transform_indices = @transform_3, window_bounds = array<i64: 1, 8, 2>}]} {
    %cst = arith.constant 0.000000e+00 : f32
    %0 = vector.broadcast %cst : f32 to vector<4x17xf32>
    %c0 = arith.constant 0 : index
    %c0_0 = arith.constant 0 : index
    %1 = vector.load %arg5[%c0, %c0_0] : memref<4x290xf32, #tpu.memory_space<vmem>>, vector<4x17xf32>
    tpu.vector_store %arg5[%c0, %c0_0], %0 {strides = array<i32>} : memref<4x290xf32, #tpu.memory_space<vmem>>, vector<4x17xf32>,
    %cst_1 = arith.constant 0.000000e+00 : f32
    %2 = vector.broadcast %cst_1 : f32 to vector<4x17xf32>
    %c0_2 = arith.constant 0 : index
    %c273 = arith.constant 273 : index
    %3 = vector.load %arg5[%c0_2, %c273] : memref<4x290xf32, #tpu.memory_space<vmem>>, vector<4x17xf32>
    tpu.vector_store %arg5[%c0_2, %c273], %2 {strides = array<i32>} : memref<4x290xf32, #tpu.memory_space<vmem>>, vector<4x17xf32>,
    %c0_3 = arith.constant 0 : index
    %c0_4 = arith.constant 0 : index
    %c0_5 = arith.constant 0 : index
    %4 = vector.load %arg1[%c0_3, %c0_4, %c0_5] : memref<1x4x256xf32, #tpu.memory_space<vmem>>, vector<1x4x256xf32>
    %5 = vector.shape_cast %4 : vector<1x4x256xf32> to vector<4x256xf32>
    %c0_6 = arith.constant 0 : index
    %c17 = arith.constant 17 : index
    %6 = vector.load %arg5[%c0_6, %c17] : memref<4x290xf32, #tpu.memory_space<vmem>>, vector<4x256xf32>
    tpu.vector_store %arg5[%c0_6, %c17], %5 {strides = array<i32>} : memref<4x290xf32, #tpu.memory_space<vmem>>, vector<4x256xf32>,
    %c0_7 = arith.constant 0 : index
    %c0_8 = arith.constant 0 : index
    %7 = vector.load %arg5[%c0_7, %c0_8] : memref<4x290xf32, #tpu.memory_space<vmem>>, vector<4x290xf32>
    %8 = tpu.iota {dimensions = array<i32: 1>} : vector<4x290xi32>
    %c16_i32 = arith.constant 16 : i32
    %c0_i32 = arith.constant 0 : i32
    %9 = arith.cmpi eq, %c16_i32, %c0_i32 : i32
    %c1_i32 = arith.constant 1 : i32
    %10 = arith.select %9, %c1_i32, %c16_i32 : i32
    %11 = vector.broadcast %10 : i32 to vector<4x290xi32>
    %12 = arith.remsi %8, %11 : vector<4x290xi32>
    %c0_i32_9 = arith.constant 0 : i32
    %13 = vector.broadcast %c0_i32_9 : i32 to vector<4x290xi32>
    %14 = arith.cmpi ne, %12, %13 : vector<4x290xi32>
    %c0_i32_10 = arith.constant 0 : i32
    %15 = vector.broadcast %c0_i32_10 : i32 to vector<4x290xi32>
    %16 = arith.cmpi slt, %12, %15 : vector<4x290xi32>
    %c0_i32_11 = arith.constant 0 : i32
    %17 = arith.cmpi slt, %10, %c0_i32_11 : i32
    %18 = vector.broadcast %17 : i1 to vector<4x290xi1>
    %19 = vector.broadcast %18 : vector<4x290xi1> to vector<4x290xi1>
    %20 = arith.xori %16, %19 : vector<4x290xi1>
    %21 = arith.andi %20, %14 : vector<4x290xi1>
    %22 = vector.broadcast %10 : i32 to vector<4x290xi32>
    %23 = arith.addi %12, %22 : vector<4x290xi32>
    %24 = arith.select %21, %23, %12 : vector<4x290xi1>, vector<4x290xi32>
    %cst_12 = arith.constant 0.000000e+00 : f32
    %25 = vector.broadcast %cst_12 : f32 to vector<4x290xf32>
    %c0_i32_13 = arith.constant 0 : i32
    %26 = vector.broadcast %c0_i32_13 : i32 to vector<4x290xi32>
    %27 = arith.cmpi eq, %24, %26 : vector<4x290xi32>
    %28 = arith.select %27, %25, %7 : vector<4x290xi1>, vector<4x290xf32>
    %c1_i32_14 = arith.constant 1 : i32
    %29 = vector.broadcast %c1_i32_14 : i32 to vector<4x290xi32>
    %30 = arith.cmpi eq, %24, %29 : vector<4x290xi32>
    %31 = arith.select %30, %25, %7 : vector<4x290xi1>, vector<4x290xf32>
    %cst_15 = arith.constant 0.000000e+00 : f32
    %32 = vector.broadcast %cst_15 : f32 to vector<8x256xf32>
    %33 = vector.extract_strided_slice %28 {offsets = [0, 0], sizes = [4, 256], strides = [1, 1]} : vector<4x290xf32> to vector<4x256xf32>
    %c0_16 = arith.constant 0 : index
    %c0_17 = arith.constant 0 : index
    %c0_18 = arith.constant 0 : index
    %34 = vector.load %arg2[%c0_16, %c0_17, %c0_18] : memref<9x8x4xf32, #tpu.memory_space<vmem>>, vector<1x8x4xf32>
    %35 = vector.shape_cast %34 : vector<1x8x4xf32> to vector<8x4xf32>
    %cst_19 = arith.constant dense<0.000000e+00> : vector<8x256xf32>
    %36 = tpu.matmul %35, %33, %cst_19 {dimension_numbers = #tpu.dot_dimension_numbers<[1], [0], [0], [1], [0, 0, 1, 1], [], []>} : vector<8x4xf32>, vector<4x256xf32>, vector<8x256xf32> -> vector<8x256xf32>
    %37 = arith.addf %32, %36 : vector<8x256xf32>
    %38 = vector.extract_strided_slice %7 {offsets = [0, 1], sizes = [4, 256], strides = [1, 1]} : vector<4x290xf32> to vector<4x256xf32>
    %c1 = arith.constant 1 : index
    %c0_20 = arith.constant 0 : index
    %c0_21 = arith.constant 0 : index
    %39 = vector.load %arg2[%c1, %c0_20, %c0_21] : memref<9x8x4xf32, #tpu.memory_space<vmem>>, vector<1x8x4xf32>
    %40 = vector.shape_cast %39 : vector<1x8x4xf32> to vector<8x4xf32>
    %cst_22 = arith.constant dense<0.000000e+00> : vector<8x256xf32>
    %41 = tpu.matmul %40, %38, %cst_22 {dimension_numbers = #tpu.dot_dimension_numbers<[1], [0], [0], [1], [0, 0, 1, 1], [], []>} : vector<8x4xf32>, vector<4x256xf32>, vector<8x256xf32> -> vector<8x256xf32>
    %42 = arith.addf %37, %41 : vector<8x256xf32>
    %43 = vector.extract_strided_slice %31 {offsets = [0, 2], sizes = [4, 256], strides = [1, 1]} : vector<4x290xf32> to vector<4x256xf32>
    %c2 = arith.constant 2 : index
    %c0_23 = arith.constant 0 : index
    %c0_24 = arith.constant 0 : index
    %44 = vector.load %arg2[%c2, %c0_23, %c0_24] : memref<9x8x4xf32, #tpu.memory_space<vmem>>, vector<1x8x4xf32>
    %45 = vector.shape_cast %44 : vector<1x8x4xf32> to vector<8x4xf32>
    %cst_25 = arith.constant dense<0.000000e+00> : vector<8x256xf32>
    %46 = tpu.matmul %45, %43, %cst_25 {dimension_numbers = #tpu.dot_dimension_numbers<[1], [0], [0], [1], [0, 0, 1, 1], [], []>} : vector<8x4xf32>, vector<4x256xf32>, vector<8x256xf32> -> vector<8x256xf32>
    %47 = arith.addf %42, %46 : vector<8x256xf32>
    %48 = vector.extract_strided_slice %28 {offsets = [0, 16], sizes = [4, 256], strides = [1, 1]} : vector<4x290xf32> to vector<4x256xf32>
    %c3 = arith.constant 3 : index
    %c0_26 = arith.constant 0 : index
    %c0_27 = arith.constant 0 : index
    %49 = vector.load %arg2[%c3, %c0_26, %c0_27] : memref<9x8x4xf32, #tpu.memory_space<vmem>>, vector<1x8x4xf32>
    %50 = vector.shape_cast %49 : vector<1x8x4xf32> to vector<8x4xf32>
    %cst_28 = arith.constant dense<0.000000e+00> : vector<8x256xf32>
    %51 = tpu.matmul %50, %48, %cst_28 {dimension_numbers = #tpu.dot_dimension_numbers<[1], [0], [0], [1], [0, 0, 1, 1], [], []>} : vector<8x4xf32>, vector<4x256xf32>, vector<8x256xf32> -> vector<8x256xf32>
    %52 = arith.addf %47, %51 : vector<8x256xf32>
    %53 = vector.extract_strided_slice %7 {offsets = [0, 17], sizes = [4, 256], strides = [1, 1]} : vector<4x290xf32> to vector<4x256xf32>
    %c4 = arith.constant 4 : index
    %c0_29 = arith.constant 0 : index
    %c0_30 = arith.constant 0 : index
    %54 = vector.load %arg2[%c4, %c0_29, %c0_30] : memref<9x8x4xf32, #tpu.memory_space<vmem>>, vector<1x8x4xf32>
    %55 = vector.shape_cast %54 : vector<1x8x4xf32> to vector<8x4xf32>
    %cst_31 = arith.constant dense<0.000000e+00> : vector<8x256xf32>
    %56 = tpu.matmul %55, %53, %cst_31 {dimension_numbers = #tpu.dot_dimension_numbers<[1], [0], [0], [1], [0, 0, 1, 1], [], []>} : vector<8x4xf32>, vector<4x256xf32>, vector<8x256xf32> -> vector<8x256xf32>
    %57 = arith.addf %52, %56 : vector<8x256xf32>
    %58 = vector.extract_strided_slice %31 {offsets = [0, 18], sizes = [4, 256], strides = [1, 1]} : vector<4x290xf32> to vector<4x256xf32>
    %c5 = arith.constant 5 : index
    %c0_32 = arith.constant 0 : index
    %c0_33 = arith.constant 0 : index
    %59 = vector.load %arg2[%c5, %c0_32, %c0_33] : memref<9x8x4xf32, #tpu.memory_space<vmem>>, vector<1x8x4xf32>
    %60 = vector.shape_cast %59 : vector<1x8x4xf32> to vector<8x4xf32>
    %cst_34 = arith.constant dense<0.000000e+00> : vector<8x256xf32>
    %61 = tpu.matmul %60, %58, %cst_34 {dimension_numbers = #tpu.dot_dimension_numbers<[1], [0], [0], [1], [0, 0, 1, 1], [], []>} : vector<8x4xf32>, vector<4x256xf32>, vector<8x256xf32> -> vector<8x256xf32>
    %62 = arith.addf %57, %61 : vector<8x256xf32>
    %63 = vector.extract_strided_slice %28 {offsets = [0, 32], sizes = [4, 256], strides = [1, 1]} : vector<4x290xf32> to vector<4x256xf32>
    %c6 = arith.constant 6 : index
    %c0_35 = arith.constant 0 : index
    %c0_36 = arith.constant 0 : index
    %64 = vector.load %arg2[%c6, %c0_35, %c0_36] : memref<9x8x4xf32, #tpu.memory_space<vmem>>, vector<1x8x4xf32>
    %65 = vector.shape_cast %64 : vector<1x8x4xf32> to vector<8x4xf32>
    %cst_37 = arith.constant dense<0.000000e+00> : vector<8x256xf32>
    %66 = tpu.matmul %65, %63, %cst_37 {dimension_numbers = #tpu.dot_dimension_numbers<[1], [0], [0], [1], [0, 0, 1, 1], [], []>} : vector<8x4xf32>, vector<4x256xf32>, vector<8x256xf32> -> vector<8x256xf32>
    %67 = arith.addf %62, %66 : vector<8x256xf32>
    %68 = vector.extract_strided_slice %7 {offsets = [0, 33], sizes = [4, 256], strides = [1, 1]} : vector<4x290xf32> to vector<4x256xf32>
    %c7 = arith.constant 7 : index
    %c0_38 = arith.constant 0 : index
    %c0_39 = arith.constant 0 : index
    %69 = vector.load %arg2[%c7, %c0_38, %c0_39] : memref<9x8x4xf32, #tpu.memory_space<vmem>>, vector<1x8x4xf32>
    %70 = vector.shape_cast %69 : vector<1x8x4xf32> to vector<8x4xf32>
    %cst_40 = arith.constant dense<0.000000e+00> : vector<8x256xf32>
    %71 = tpu.matmul %70, %68, %cst_40 {dimension_numbers = #tpu.dot_dimension_numbers<[1], [0], [0], [1], [0, 0, 1, 1], [], []>} : vector<8x4xf32>, vector<4x256xf32>, vector<8x256xf32> -> vector<8x256xf32>
    %72 = arith.addf %67, %71 : vector<8x256xf32>
    %73 = vector.extract_strided_slice %31 {offsets = [0, 34], sizes = [4, 256], strides = [1, 1]} : vector<4x290xf32> to vector<4x256xf32>
    %c8 = arith.constant 8 : index
    %c0_41 = arith.constant 0 : index
    %c0_42 = arith.constant 0 : index
    %74 = vector.load %arg2[%c8, %c0_41, %c0_42] : memref<9x8x4xf32, #tpu.memory_space<vmem>>, vector<1x8x4xf32>
    %75 = vector.shape_cast %74 : vector<1x8x4xf32> to vector<8x4xf32>
    %cst_43 = arith.constant dense<0.000000e+00> : vector<8x256xf32>
    %76 = tpu.matmul %75, %73, %cst_43 {dimension_numbers = #tpu.dot_dimension_numbers<[1], [0], [0], [1], [0, 0, 1, 1], [], []>} : vector<8x4xf32>, vector<4x256xf32>, vector<8x256xf32> -> vector<8x256xf32>
    %77 = arith.addf %72, %76 : vector<8x256xf32>
    %c0_44 = arith.constant 0 : index
    %c0_45 = arith.constant 0 : index
    %c0_46 = arith.constant 0 : index
    %78 = vector.load %arg3[%c0_44, %c0_45, %c0_46] : memref<1x8x256xf32, #tpu.memory_space<vmem>>, vector<1x8x256xf32>
    %79 = vector.shape_cast %78 : vector<1x8x256xf32> to vector<8x256xf32>
    %80 = vector.shape_cast %77 : vector<8x256xf32> to vector<1x8x256xf32>
    tpu.vector_store %arg3[%c0_44, %c0_45, %c0_46], %80 {strides = array<i32>} : memref<1x8x256xf32, #tpu.memory_space<vmem>>, vector<1x8x256xf32>,
    %cst_47 = arith.constant dense<0.000000e+00> : vector<8xf32>
    %81 = vector.multi_reduction <add>, %77, %cst_47 [1] : vector<8x256xf32> to vector<8xf32>
    %82 = vector.shape_cast %81 : vector<8xf32> to vector<8x1xf32>
    %c0_48 = arith.constant 0 : index
    %c0_49 = arith.constant 0 : index
    %c0_50 = arith.constant 0 : index
    %83 = vector.load %arg4[%c0_48, %c0_49, %c0_50] : memref<1x8x2xf32, #tpu.memory_space<vmem>>, vector<1x8x1xf32>
    %84 = vector.shape_cast %83 : vector<1x8x1xf32> to vector<8x1xf32>
    %85 = vector.shape_cast %82 : vector<8x1xf32> to vector<1x8x1xf32>
    tpu.vector_store %arg4[%c0_48, %c0_49, %c0_50], %85 {strides = array<i32>} : memref<1x8x2xf32, #tpu.memory_space<vmem>>, vector<1x8x1xf32>,
    %86 = arith.mulf %77, %77 : vector<8x256xf32>
    %cst_51 = arith.constant dense<0.000000e+00> : vector<8xf32>
    %87 = vector.multi_reduction <add>, %86, %cst_51 [1] : vector<8x256xf32> to vector<8xf32>
    %88 = vector.shape_cast %87 : vector<8xf32> to vector<8x1xf32>
    %c0_52 = arith.constant 0 : index
    %c0_53 = arith.constant 0 : index
    %c1_54 = arith.constant 1 : index
    %89 = vector.load %arg4[%c0_52, %c0_53, %c1_54] : memref<1x8x2xf32, #tpu.memory_space<vmem>>, vector<1x8x1xf32>
    %90 = vector.shape_cast %89 : vector<1x8x1xf32> to vector<8x1xf32>
    %91 = vector.shape_cast %88 : vector<8x1xf32> to vector<1x8x1xf32>
    tpu.vector_store %arg4[%c0_52, %c0_53, %c1_54], %91 {strides = array<i32>} : memref<1x8x2xf32, #tpu.memory_space<vmem>>, vector<1x8x1xf32>,
    return
  }
  func.func @transform_0(%arg0: i32) -> (i32, i32, i32) {
    %c0_i32 = arith.constant 0 : i32
    %c0_i32_0 = arith.constant 0 : i32
    %c0_i32_1 = arith.constant 0 : i32
    return %arg0, %c0_i32, %c0_i32_0 : i32, i32, i32
  }
  func.func @transform_1(%arg0: i32) -> (i32, i32, i32) {
    %c0_i32 = arith.constant 0 : i32
    %c0_i32_0 = arith.constant 0 : i32
    %c0_i32_1 = arith.constant 0 : i32
    %c0_i32_2 = arith.constant 0 : i32
    return %c0_i32, %c0_i32_0, %c0_i32_1 : i32, i32, i32
  }
  func.func @transform_2(%arg0: i32) -> (i32, i32, i32) {
    %c0_i32 = arith.constant 0 : i32
    %c0_i32_0 = arith.constant 0 : i32
    %c0_i32_1 = arith.constant 0 : i32
    return %arg0, %c0_i32, %c0_i32_0 : i32, i32, i32
  }
  func.func @transform_3(%arg0: i32) -> (i32, i32, i32) {
    %c0_i32 = arith.constant 0 : i32
    %c0_i32_0 = arith.constant 0 : i32
    %c0_i32_1 = arith.constant 0 : i32
    return %arg0, %c0_i32, %c0_i32_0 : i32, i32, i32
  }
}

</mosaic_0001>

<bundles_post_ra>
// kernel: tpu_custom_call.1
= control target key start
LH: loop header
LB: loop body
LE: loop exit
PB: predicated region body
PF: predicated region fallthrough
CT: control target
= control target key end

     0   :  { %9 = vsyncpa [#allocation4], 0  ;;  %s1577_s0 = inlined_call_operand.vmem [shape: f32[2,4,256], index: 0, kind: input, shape index: {}]   ;;  %s1578_s1 = inlined_call_operand.vmem [shape: f32[9,8,4], index: 1, kind: input, shape index: {}]   ;;  %s1579_s2 = inlined_call_operand.hbm [shape: f32[2,8,256], index: 2, kind: output, shape index: {0}]   ;;  %s1580_s3 = inlined_call_operand.vmem [shape: f32[2,8,2], index: 3, kind: output, shape index: {1}]  }
   0x1   :  { %11 = vsyncpa [#allocation4 + $0x1], 0  ;;  %s1399_s12 = smov 0   ;;  %s1401_s13 = smov 0  }
   0x2   :  { %s1403_s14 = smov 0   ;;  %s1405_s15 = smov 0  }
   0x3 LB: > { %s1420_s16 = sadd.s32 4294967295, %s1366_s15   ;;  %s1188_s17 = sadd.s32 4294967294, %s1366_s15   ;;  %s1366_s15 = sphi %s1405_s15, %s1586_s15   ;;  %s1362_s14 = sphi %s1403_s14, %s1585_s14   ;;  %s1358_s13 = sphi %s1401_s13, %s1584_s13   ;;  %s1354_s12 = sphi %s1399_s12, %s1583_s12  }
   0x4   : > { %s1424_s18 = sadd.s32 1, %s1366_s15   ;;  %s71_s19 = sadd.s32 1, %s1362_s14 }
   0x5   : > { %s68_s20 = ssub.s32 %s1366_s15, %s1424_s18  ;;  %p81_p0 = scmp.ne.s32.totalorder %s1362_s14, %s1358_s13 }
   0x6   : > { %p69_p1 = scmp.eq.s32.totalorder %s68_s20, 0  ;;  %p82_p2 = scmp.eq.s32.totalorder %s1420_s16, 1 }
   0x7   : > { %p87_p3 = scmp.ne.s32.totalorder %s1358_s13, %s1354_s12  ;;  %p88_p4 = scmp.eq.s32.totalorder %s1188_s17, 1 }
   0x8   : > { %s1435_s21 = scalar_select %p69_p1, %s1362_s14, %s71_s19  }
   0x9   : > { %p1437_p5 = por %p82_p2, %p81_p0  ;;  %p1441_p6 = por %p88_p4, %p87_p3 }
   0xa   : > { %p1191_p7 = scmp.ge.s32.totalorder %s1366_s15, 1  ;;  %p143_p8 = scmp.lt.s32.totalorder %s1366_s15, 3 }
   0xc   : > { %p144_p9 = pnand %p1191_p7, %p143_p8 }
   0xd   : > { %p171_p10 = scmp.lt.s32.totalorder (!%p144_p9), %s1420_s16, 1  ;;  %vm180_vm0 = vcmask (!%p144_p9), 134144   ;;  %vm182_vm1 = vcmask (!%p144_p9), 273544   ;;  %v1368_v0 = vmov (!%p144_p9), 0.0   ;;  %s1369_s29 = smov (!%p144_p9), 17   ;;  %vm193_vm2 = vcmask (!%p144_p9), 1043592  }
   0xe   : > { %147 = sbr.rel (%p144_p9) target bundleno = 675 (0x2a3), region = 28  ;;  %181 = vst.msk [vmem:[#allocation2] sm:$0xf] (!%p144_p9), %vm180_vm0, %v1368_v0  ;;  %696 = vmatprep.mubr.f32.mxu0 (!%p144_p9), %v1368_v0  ;;  %341 = vmatprep.mubr.f32.mxu1 (!%p144_p9), %v1368_v0  ;;  %vm194_vm3 = vcmask (!%p144_p9), 1047556   ;;  %vm189_vm4 = vcmask (!%p144_p9), 138240   ;;  %v200_v4 = vlaneseq (!%p144_p9)  ;;  %s1370_s30 = smov (!%p144_p9), 111  }
   0xf   : > { %183 = vst.msk [vmem:[#allocation2 + $0x8] sm:$0xf] (!%p144_p9), %vm182_vm1, %v1368_v0  ;;  %vm195_vm5 = vmor (!%p144_p9), %vm194_vm3, %vm193_vm2  ;;  %s1371_s4 = smov (!%p144_p9), 127   ;;  %s1372_s5 = smov (!%p144_p9), 96   ;;  %vm622_vm12 = vcmask (!%p144_p9), 908288   ;;  %vm272_vm13 = vcmask (!%p144_p9), 1043456  }
  0x10   : > { %v201_v6 = vand.u32 (!%p144_p9), 127, %v200_v4  ;;  %s1373_s6 = smov (!%p144_p9), 110   ;;  %s1374_s7 = smov (!%p144_p9), 126   ;;  %vm268_vm14 = vcmask (!%p144_p9), 31744   ;;  %v1211_v29 = vld [vmem:[%s1578_s1 + $0x20] sm:$0xff] (!%p144_p9)  ;;  %vm265_vm15 = vcmask (!%p144_p9), 1039360  }
  0x11   : > { %s1375_s8 = smov (!%p144_p9), 95   ;;  %s1376_s9 = smov (!%p144_p9), 112   ;;  %v1196_v34 = vld [vmem:[%s1578_s1 + $0x8] sm:$0xff] (!%p144_p9)  ;;  %v256_v42 = vld [vmem:[%s1578_s1] sm:$0xff] (!%p144_p9)  ;;  %vm804_vm1 = vcmask (!%p144_p9), 785408   ;;  %vm895_vm2 = vcmask (!%p144_p9), 777216  }
  0x12   : > { %v208_v7 = vand.u32 (!%p144_p9), 15, %v201_v6  ;;  %v203_v10 = vadd.s32 (!%p144_p9), 256, %v201_v6  ;;  %v202_v13 = vadd.s32 (!%p144_p9), 128, %v201_v6  ;;  %s1377_s10 = smov (!%p144_p9), 94   ;;  %v1215_v39 = vld [vmem:[%s1578_s1 + $0x28] sm:$0xff] (!%p144_p9)  ;;  %v1219_v48 = vld [vmem:[%s1578_s1 + $0x30] sm:$0xff] (!%p144_p9) }
  0x13   : > { %vm439_vm3 = vcmask (!%p144_p9), 1031168   ;;  %v1203_v55 = vld [vmem:[%s1578_s1 + $0x10] sm:$0xff] (!%p144_p9)  ;;  %v1223_v58 = vld [vmem:[%s1578_s1 + $0x38] sm:$0xff] (!%p144_p9)  ;;  %s162_s19 = sand.u32 (!%p144_p9), 1, %s1358_s13   ;;  %s1237_s27 = sshll.u32 (!%p144_p9), %s1420_s16, 8 }
  0x14   : > { %vm240_vm6 = vcmp.eq.s32.totalorder (!%p144_p9), %v208_v7, 0  ;;  %v222_v12 = vand.u32 (!%p144_p9), 15, %v203_v10  ;;  %v215_v15 = vand.u32 (!%p144_p9), 15, %v202_v13  ;;  %vm250_vm10 = vcmp.eq.s32.totalorder (!%p144_p9), %v208_v7, 1  ;;  %s1192_s20 = sshll.u32 (!%p144_p9), %s162_s19, 4 }
  0x15   : > { %s1454_s24 = scalar_select %p171_p10, %s1420_s16, 1 }
  0x16   : > { %vm252_vm7 = vcmp.eq.s32.totalorder %v222_v12, 1  ;;  %vm242_vm8 = vcmp.eq.s32.totalorder %v222_v12, 0  ;;  %vm251_vm9 = vcmp.eq.s32.totalorder %v215_v15, 1  ;;  %vm241_vm11 = vcmp.eq.s32.totalorder %v215_v15, 0  ;;  %s164_s26 = scalar_lea.vmem [#allocation3], %s1192_s20 }
  0x17   : > { %s1236_s25 = sshll.u32 %s1454_s24, 3 }
  0x18   : > { %s175_s28 = scalar_lea.vmem %s1577_s0, %s1236_s25 }
  0x19   : > { %v184_v1 = vld [vmem:[%s175_s28] sm:$0xff]  ;;  %s1102_s28 = sshll.u32 %s164_s26, 4  ;;  %s1103_s28 = int_to_ptr.vmem [resolvable:$true] %s1102_s28 }
  0x1a   : > { %186 = vrot.lane.b32.xlu0 %v184_v1, %s1369_s29 }
  0x8c   : > { %v187_v2 = vpop.permute.xlu0 %186 }
  0x8d   : > { %v188_v3 = vrot.slane %v187_v2, 4 }
  0x8f   : > { %v190_v5 = vsel %vm189_vm4, %v188_v3, %v187_v2  ;;  %197 = vst.msk [vmem:[#allocation2 + $0x8] sm:$0xf] %vm180_vm0, %v188_v3  ;;  %vm713_vm0 = vcmask 900096   ;;  %vm531_vm4 = vcmask 916480   ;;  %v1207_v2 = vld [vmem:[%s1578_s1 + $0x18] sm:$0xff] }
  0x90   : > { %196 = vst.msk [vmem:[#allocation2] sm:$0xff] %vm195_vm5, %v190_v5  ;;  %vm986_vm5 = vcmask 769024   ;;  %v1227_v5 = vld [vmem:[%s1578_s1 + $0x40] sm:$0xff] }
  0x96   : > { %v199_v8 = vld [vmem:[#allocation2 + $0x8] sm:$0xf] }
  0x97   : > { %620 = vrot.lane.b32.xlu1 %v199_v8, %s1370_s30  ;;  %v198_v9 = vld [vmem:[#allocation2] sm:$0xff]  ;;  %v255_v16 = vsel %vm252_vm7, 0.0, %v199_v8  ;;  %v249_v17 = vsel %vm242_vm8, 0.0, %v199_v8 }
  0x98   : > { %259 = vrot.lane.b32.xlu0 %v198_v9, %s1371_s4  ;;  %v1463_v11 = vsel %vm240_vm6, 0.0, %v198_v9  ;;  %v245_v14 = vcombine.high %v198_v9, %v198_v9  ;;  %v253_v19 = vsel %vm250_vm10, 0.0, %v198_v9 }
  0x9a   : > { %v254_v18 = vsel %vm251_vm9, 0.0, %v245_v14  ;;  %v248_v20 = vsel %vm241_vm11, 0.0, %v245_v14 }
  0x9b   : > { %263 = vrot.lane.b32.xlu1 %v199_v8, %s1371_s4 }
  0x9c   : > { %798 = vrot.lane.b32.xlu0 %v1463_v11, %s1372_s5 }
  0x9f   : > { %616 = vrot.lane.b32.xlu1 %v198_v9, %s1370_s30 }
  0xa0   : > { %618 = vrot.lane.b32.xlu0 %v245_v14, %s1370_s30 }
  0xa3   : > { %711 = vrot.lane.b32.xlu1 %v255_v16, %s1373_s6 }
  0xa4   : > { %261 = vrot.lane.b32.xlu0 %v245_v14, %s1371_s4  ;;  %s1536_s4 = scalar_lea.hbm %s1579_s2, %s1237_s27 }
  0xa7   : > { %802 = vrot.lane.b32.xlu1 %v249_v17, %s1372_s5 }
  0xa8   : > { %709 = vrot.lane.b32.xlu0 %v254_v18, %s1373_s6 }
  0xab   : > { %707 = vrot.lane.b32.xlu1 %v253_v19, %s1373_s6  ;;  %s1304_s6 = scalar_lea.vmem %s1103_s28, 256 }
  0xac   : > { %437 = vrot.lane.b32.xlu0 %v255_v16, %s1374_s7  ;;  %p1305_p11 = scmp.ne.s32.totalorder %s1103_s28, %s1304_s6 }
  0xae   : > { %p1306_p12 = pnand %p1305_p11, %p1437_p5 }
  0xaf   : > { %891 = vrot.lane.b32.xlu1 %v245_v14, %s1375_s8 }
  0xb0   : > { %800 = vrot.lane.b32.xlu0 %v248_v20, %s1372_s5  ;;  %s1084_s5 = scalar_lea.sflag [#allocation4], %s162_s19  ;;  %p1307_p13 = pneg %p1306_p12 }
  0xb3   : > { %433 = vrot.lane.b32.xlu1 %v253_v19, %s1374_s7 }
  0xb4   : > { %893 = vrot.lane.b32.xlu0 %v199_v8, %s1375_s8 }
  0xb7   : > { %435 = vrot.lane.b32.xlu1 %v254_v18, %s1374_s7  ;;  %s1378_s7 = smov [#allocation3]  }
  0xb8   : > { %889 = vrot.lane.b32.xlu0 %v198_v9, %s1375_s8  ;;  %s1308_s8 = sshll.u32 %s1378_s7, 4  ;;  %s1309_s8 = int_to_ptr.vmem [resolvable:$false] %s1308_s8 }
  0xb9   : > { %p1311_p0 = scmp.lt.s32.totalorder %s1103_s28, %s1309_s8 }
  0xbb   : > { %527 = vrot.lane.b32.xlu1 %v248_v20, %s1376_s9 }
  0xbc   : > { %529 = vrot.lane.b32.xlu0 %v249_v17, %s1376_s9 }
  0xbf   : > { %982 = vrot.lane.b32.xlu1 %v254_v18, %s1377_s10 }
  0xc0   : > { %984 = vrot.lane.b32.xlu0 %v255_v16, %s1377_s10 }
  0xc3   : > { %525 = vrot.lane.b32.xlu1 %v1463_v11, %s1376_s9  ;;  %s1310_s9 = scalar_lea.vmem %s1309_s8, 512 }
  0xc4   : > { %980 = vrot.lane.b32.xlu0 %v253_v19, %s1377_s10  ;;  %p1312_p1 = scmp.lt.s32.totalorder %s1310_s9, %s1304_s6 }
  0xc6   : > { %p1313_p2 = por %p1312_p1, %p1311_p0 }
  0xc8   : > { %p1314_p3 = pnand %p1313_p2, %p1307_p13 }
 0x109   : > { %v621_v21 = vpop.permute.xlu1 %620 }
 0x10a   : > { %v260_v22 = vpop.permute.xlu0 %259 }
 0x10d   : > { %v264_v23 = vpop.permute.xlu1 %263 }
 0x10e   : > { %v799_v24 = vpop.permute.xlu0 %798 }
 0x111   : > { %v617_v25 = vpop.permute.xlu1 %616 }
 0x112   : > { %v619_v26 = vpop.permute.xlu0 %618 }
 0x113   : > { %v624_v27 = vsel %vm622_vm12, %v619_v26, %v621_v21  ;;  %v623_v28 = vsel %vm622_vm12, %v617_v25, %v619_v26 }
 0x114   : > { %1212 = vmatprep.subr.msk.mxu0 %vm272_vm13, %v624_v27 }
 0x115   : > { %v712_v30 = vpop.permute.xlu1 %711  ;;  %1213 = vmatpush1.msk.msra.mxu0 %vm272_vm13, %v623_v28 }
 0x116   : > { %v262_v31 = vpop.permute.xlu0 %261  ;;  %1214 = vmatmul.mubr.msk.f32.vlgmr.msra.gmra.mrb[0].mxu0 %vm268_vm14, %v1211_v29 }
 0x117   : > { %v267_v32 = vsel %vm265_vm15, %v262_v31, %v264_v23  ;;  %v266_v33 = vsel %vm265_vm15, %v260_v22, %v262_v31  ;;  %787 = vmatprep.mubr.f32.mxu0 %v1368_v0 }
 0x118   : > { %1197 = vmatprep.subr.msk.mxu1 %vm272_vm13, %v267_v32 }
 0x119   : > { %v803_v35 = vpop.permute.xlu1 %802  ;;  %1198 = vmatpush1.msk.msra.mxu1 %vm272_vm13, %v266_v33 }
 0x11a   : > { %v710_v36 = vpop.permute.xlu0 %709  ;;  %1200 = vmatprep.subr.msk.mxu1 %vm272_vm13, %v248_v20  ;;  %1199 = vmatmul.mubr.msk.f32.vlgmr.msra.gmra.mrb[0].mxu1 %vm268_vm14, %v1196_v34 }
 0x11b   : > { %v715_v37 = vsel %vm713_vm0, %v710_v36, %v712_v30  ;;  %1201 = vmatpush1.msk.msra.mxu1 %vm272_vm13, %v1463_v11  ;;  %421 = vmatprep.mubr.f32.mxu1 %v1368_v0 }
 0x11c   : > { %1216 = vmatprep.subr.msk.mxu0 %vm272_vm13, %v715_v37 }
 0x11d   : > { %v708_v38 = vpop.permute.xlu1 %707 }
 0x11e   : > { %v714_v40 = vsel %vm713_vm0, %v708_v38, %v710_v36  ;;  %v438_v41 = vpop.permute.xlu0 %437 }
 0x11f   : > { %1217 = vmatpush1.msk.msra.mxu0 %vm272_vm13, %v714_v40 }
 0x120   : > { %1218 = vmatmul.mubr.msk.f32.vlgmr.msra.gmra.mrb[0].mxu0 %vm268_vm14, %v1215_v39 }
 0x121   : > { %v892_v43 = vpop.permute.xlu1 %891  ;;  %878 = vmatprep.mubr.f32.mxu0 %v1368_v0 }
 0x122   : > { %v801_v44 = vpop.permute.xlu0 %800  ;;  %1202 = vmatmul.mubr.msk.f32.vlgmr.msra.gmra.mrb[0].mxu1 %vm268_vm14, %v256_v42 }
 0x123   : > { %v805_v45 = vsel %vm804_vm1, %v799_v24, %v801_v44  ;;  %v806_v46 = vsel %vm804_vm1, %v801_v44, %v803_v35  ;;  %513 = vmatprep.mubr.f32.mxu1 %v1368_v0 }
 0x124   : > { %1220 = vmatprep.subr.msk.mxu0 %vm272_vm13, %v806_v46 }
 0x125   : > { %v434_v47 = vpop.permute.xlu1 %433  ;;  %1221 = vmatpush1.msk.msra.mxu0 %vm272_vm13, %v805_v45 }
 0x126   : > { %v894_v49 = vpop.permute.xlu0 %893 }
 0x127   : > { %v897_v50 = vsel %vm895_vm2, %v892_v43, %v894_v49 }
 0x128   : > { %1224 = vmatprep.subr.msk.mxu0 %vm272_vm13, %v897_v50  ;;  %1222 = vmatmul.mubr.msk.f32.vlgmr.msra.gmra.mrb[0].mxu0 %vm268_vm14, %v1219_v48 }
 0x129   : > { %v436_v51 = vpop.permute.xlu1 %435  ;;  %969 = vmatprep.mubr.f32.mxu0 %v1368_v0 }
 0x12a   : > { %v440_v52 = vsel %vm439_vm3, %v434_v47, %v436_v51  ;;  %v441_v53 = vsel %vm439_vm3, %v436_v51, %v438_v41  ;;  %v890_v54 = vpop.permute.xlu0 %889 }
 0x12b   : > { %v896_v56 = vsel %vm895_vm2, %v890_v54, %v892_v43  ;;  %1204 = vmatprep.subr.msk.mxu1 %vm272_vm13, %v441_v53 }
 0x12c   : > { %1205 = vmatpush1.msk.msra.mxu1 %vm272_vm13, %v440_v52  ;;  %1225 = vmatpush1.msk.msra.mxu0 %vm272_vm13, %v896_v56 }
 0x12d   : > { %v528_v57 = vpop.permute.xlu1 %527  ;;  %1206 = vmatmul.mubr.msk.f32.vlgmr.msra.gmra.mrb[0].mxu1 %vm268_vm14, %v1203_v55 }
 0x12e   : > { %v530_v59 = vpop.permute.xlu0 %529  ;;  %605 = vmatprep.mubr.f32.mxu1 %v1368_v0 }
 0x12f   : > { %v533_v60 = vsel %vm531_vm4, %v528_v57, %v530_v59 }
 0x130   : > { %1208 = vmatprep.subr.msk.mxu1 %vm272_vm13, %v533_v60  ;;  %1226 = vmatmul.mubr.msk.f32.vlgmr.msra.gmra.mrb[0].mxu0 %vm268_vm14, %v1223_v58 }
 0x131   : > { %v983_v61 = vpop.permute.xlu1 %982  ;;  %1060 = vmatprep.mubr.f32.mxu0 %v1368_v0 }
 0x132   : > { %v985_v62 = vpop.permute.xlu0 %984 }
 0x133   : > { %v988_v63 = vsel %vm986_vm5, %v983_v61, %v985_v62 }
 0x134   : > { %1228 = vmatprep.subr.msk.mxu0 %vm272_vm13, %v988_v63 }
 0x135   : > { %v526_v1 = vpop.permute.xlu1 %525 }
 0x136   : > { %v532_v3 = vsel %vm531_vm4, %v526_v1, %v528_v57  ;;  %v981_v4 = vpop.permute.xlu0 %980 }
 0x137   : > { %v987_v6 = vsel %vm986_vm5, %v981_v4, %v983_v61  ;;  %1209 = vmatpush1.msk.msra.mxu1 %vm272_vm13, %v532_v3 }
 0x138   : > { %1210 = vmatmul.mubr.msk.f32.vlgmr.msra.gmra.mrb[0].mxu1 %vm268_vm14, %v1207_v2  ;;  %1229 = vmatpush1.msk.msra.mxu0 %vm272_vm13, %v987_v6 }
 0x139   : > { %1230 = vmatmul.mubr.msk.f32.vlgmr.msra.gmra.mrb[0].mxu0 %vm268_vm14, %v1227_v5 }
 0x20b   : > { %v607_v0 = vpop.f32.mrb[0].mxu1 }
 0x20c   : > { %v609_v7 = vpop.f32.mrb[1].mxu1  ;;  %v1062_v8 = vpop.f32.mrb[0].mxu0 }
 0x20d   : > { %v1238_v9 = vadd.f32 %v1062_v8, %v607_v0  ;;  %v1064_v10 = vpop.f32.mrb[1].mxu0 }
 0x20e   : > { %v1239_v11 = vadd.f32 %v1064_v10, %v609_v7 }
 0x20f   : > { %1069 = vst [vmem:[%s164_s26] sm:$0xff] %v1238_v9  ;;  %v1076_v12 = vmul.f32 %v1238_v9, %v1238_v9 }
 0x210   : > { %1070 = vst [vmem:[%s164_s26 + $0x8] sm:$0xff] %v1239_v11  ;;  %v1071_v13 = vadd.f32 %v1239_v11, %v1238_v9  ;;  %v1077_v14 = vmul.f32 %v1239_v11, %v1239_v11 }
 0x212   : > { %1072 = vadd.xlane.f32.xlu1 %v1071_v13  ;;  %v1078_v15 = vadd.f32 %v1077_v14, %v1076_v12 }
 0x214   : > { %1079 = vadd.xlane.f32.xlu0 %v1078_v15 }
 0x215   : > { %1317 = shalt.err (!%p1314_p3)
}
 0x216   : > { %s1318_s16 = scalar_lea.hbm %s1536_s4, 256  ;;  %s1322_s17 = scalar_lea.hbm %s1579_s2, 512 }
 0x217   : > { %p1319_p4 = scmp.ne.s32.totalorder %s1536_s4, %s1318_s16  ;;  %p1323_p9 = scmp.lt.u32.totalorder %s1536_s4, %s1579_s2 }
 0x218   : > { %p1324_p10 = scmp.lt.u32.totalorder %s1322_s17, %s1318_s16  ;;  %p1326_p12 = scmp.lt.u32.totalorder %s1318_s16, %s1536_s4 }
 0x219   : > { %p1320_p7 = pnand %p1319_p4, %p1437_p5 }
 0x21a   : > { %p1325_p11 = por %p1324_p10, %p1323_p9 }
 0x21b   : > { %p1321_p8 = pneg %p1320_p7 }
 0x21c   : > { %p1327_p13 = por %p1326_p12, %p1325_p11 }
 0x21e   : > { %p1328_p0 = pnand %p1327_p13, %p1321_p8 }
 0x220   : > { %1331 = shalt.err (!%p1328_p0)
}
 0x221   : > { %1254 = dma.vmem_to_hbm [thread:$0]  (%p1437_p5), %s1103_s28, 256, %s1536_s4, %s1084_s5   ;;  %vm1074_vm6 = vcmask 7168   ;;  %vm1081_vm7 = vcmask 15368  }
 0x222   : > { %s179_s29 = scalar_lea.vmem %s1580_s3, %s1236_s25 }
 0x29f   : > { %v1073_v16 = vpop.xlane.xlu1 %1072 }
 0x2a0   : > { %1075 = vst.msk [vmem:[%s179_s29] sm:$0xff] %vm1074_vm6, %v1073_v16 }
 0x2a1   : > { %v1080_v17 = vpop.xlane.xlu0 %1079 }
 0x2a2   : > { %1082 = vst.msk [vmem:[%s179_s29] sm:$0xff] %vm1081_vm7, %v1080_v17 }
 0x2a3 PF: > { %p1260_p1 = scmp.ge.s32.totalorder %s1366_s15, 2  ;;  %s1117_s22 = sand.u32 1, %s1354_s12  }
 0x2a4   : > { %s1118_s28 = scalar_lea.sflag [#allocation4], %s1117_s22 }
 0x2a5   : > { %p1257_p2 = pnand %p1260_p1, %p1441_p6 }
 0x2a7   : > { %1349 = dma.done.wait (!%p1257_p2), %s1118_s28, 256  }
 0x2a8   : > { %1351 = vsyncadd (!%p1257_p2), %s1118_s28, 4294967040  ;;  %p14_p5 = scmp.ge.s32.totalorder %s1424_s18, 4   ;;  %s1583_s12 = smov %s1358_s13 }
 0x2a9   : > { %s1584_s13 = smov %s1362_s14  ;;  %s1585_s14 = smov %s1435_s21 }
 0x2aa   : > { %s1586_s15 = smov %s1424_s18  ;;  %16 = sbr.rel (!%p14_p5) target bundleno = 3 (0x3), region = 83 }
 0x2b1   :  { %1130 = vsyncpa [#allocation4], 1 }
 0x2b2   :  { %1132 = vsyncpa [#allocation4 + $0x1], 1 }

</bundles_post_ra>
